<compile_context>
chip_gen: v7x
topology: tpu7x:2x2x1
jax: 0.10.0
libtpu: 0.0.40
codegen_flags: <defaults>
</compile_context>

<pallas_src>
import functools

import jax
import jax.numpy as jnp
from jax import lax
from jax.experimental import pallas as pl
from jax.experimental.pallas import tpu as pltpu

_INT32_MIN = -(2 ** 31)
_SIGN_MASK = 0x7FFFFFFF


def _ordered_int32(x):
    """Monotone f32 -> int32 key:  a >= b (float)  <=>  key(a) >= key(b) (int32)."""
    b = pltpu.bitcast(x, jnp.int32)
    return jnp.where(b < 0, b ^ jnp.int32(_SIGN_MASK), b)


def _key_to_float(key):
    """Inverse of _ordered_int32 (wrapper-side, plain XLA)."""
    bits = jnp.where(key < 0, key ^ jnp.int32(_SIGN_MASK), key)
    return lax.bitcast_convert_type(bits, jnp.float32)


# --------------------------------------------------------------------------------------
# Kernel 1: encoder.  grid over S tiles ("parallel").  h_tile = xc @ w_enc_tile.T
# --------------------------------------------------------------------------------------
def _encoder_kernel(xc_ref, w_ref, h_ref):
    # xc: (bs, D) bf16 (precomputed x - bias_pre); w: (s_tile, D) bf16 -> (bs, s_tile) f32
    h_ref[...] = lax.dot_general(
        xc_ref[...], w_ref[...], (((1,), (1,)), ((), ())),
        preferred_element_type=jnp.float32)


# --------------------------------------------------------------------------------------
# Kernel 2: thresholds + last_activation (single step, full h resident in VMEM).
#   * global top-(k*bs) key      : 32-pass bitwise binary search over monotone int keys
#   * per-row dead top-(2k) keys : vectorized 32-pass binary search (dead mask folded
#                                  into the count, no separate masked-key temporary)
# --------------------------------------------------------------------------------------
def _threshold_kernel(h_ref, la_ref, la_out_ref, gkey_ref, rkey_ref,
                      *, k, dead_threshold):
    # Inputs assumed finite (no NaN/Inf), so max(key) + 1 cannot overflow int32.
    bs = h_ref.shape[0]
    kb = k * bs
    h = h_ref[...]                                     # (bs, S) f32
    oh = _ordered_int32(h)                             # (bs, S) i32 order-preserving keys
    # TODO(synk): for very large bs*S (h + keys exceed VMEM) this step needs a streamed
    # per-tile count pass instead of a resident (bs, S) block.

    # ---- global top-(k*bs) threshold key ----
    lo = jnp.min(oh, keepdims=True)                    # count(oh >= lo) = bs*S >= kb
    hi = jnp.max(oh, keepdims=True) + 1                # count(oh >= hi) = 0     <  kb

    def gstep(_, carry):
        lo_, hi_ = carry
        mid = (lo_ & hi_) + ((lo_ ^ hi_) >> 1)         # overflow-free floor midpoint
        ge = jnp.sum((oh >= mid).astype(jnp.int32), keepdims=True) >= kb
        return jnp.where(ge, mid, lo_), jnp.where(ge, hi_, mid)

    lo, _ = lax.fori_loop(0, 32, gstep, (lo, hi))
    # lo == key of the exact (k*bs)-th largest element of h (no-ties assumption).
    gkey_ref[...] = lo

    # ---- dead-feature bookkeeping (last_activation update) ----
    fired = jnp.max(jnp.where((oh >= lo) & (h != 0.0), 1.0, 0.0),
                    axis=0, keepdims=True)             # (1, S): "any over batch"
    la_new = (la_ref[...] + 1.0) * (1.0 - fired)
    la_out_ref[...] = la_new

    # ---- per-row top-(2k) among dead features ----
    dm = la_new > dead_threshold                       # (1, S)
    int_min = jnp.int32(_INT32_MIN)
    # lo_r = INT32_MIN selects ALL dead features when a row has < 2k of them
    # (matches the -inf fill + zeroing in the PyTorch reference).
    lo_r = jnp.full((bs, 1), int_min, jnp.int32)
    hi_r = jnp.max(jnp.where(dm, oh, int_min), axis=1, keepdims=True) + 1

    def rstep(_, carry):
        lo_, hi_ = carry
        mid = (lo_ & hi_) + ((lo_ ^ hi_) >> 1)
        cnt = jnp.sum((dm & (oh >= mid)).astype(jnp.int32), axis=1, keepdims=True)
        ge = cnt >= 2 * k
        return jnp.where(ge, mid, lo_), jnp.where(ge, hi_, mid)

    lo_r, _ = lax.fori_loop(0, 32, rstep, (lo_r, hi_r))
    rkey_ref[...] = lo_r


# --------------------------------------------------------------------------------------
# Kernel 3: key-space selection + fused decode.  grid (n_d "parallel", n_s "arbitrary").
# recon / dead_recon are the resident accumulators (constant block index over s).
# --------------------------------------------------------------------------------------
def _decode_kernel(h_ref, la_ref, gkey_ref, rkey_ref, bias_ref, w_ref,
                   recon_ref, dead_ref, *, dead_threshold, s_tile):
    s = pl.program_id(1)
    bs = h_ref.shape[0]

    @pl.when(s == 0)
    def _init():
        recon_ref[...] = jnp.zeros_like(recon_ref)
        dead_ref[...] = jnp.zeros_like(dead_ref)

    start = pl.multiple_of(s * s_tile, s_tile)
    h_t = h_ref[:, pl.ds(start, s_tile)]                         # (bs, s_tile) f32
    oh_t = _ordered_int32(h_t)                                   # (bs, s_tile) i32
    dm_t = la_ref[:, pl.ds(start, s_tile)] > dead_threshold      # (1,  s_tile)

    topk_t = jnp.where(oh_t >= gkey_ref[...], h_t, 0.0)          # global top-(k*bs)
    dead_t = jnp.where(dm_t & (oh_t >= rkey_ref[...]), h_t, 0.0)  # per-row dead top-(2k)

    # One fused MXU call: the W_dec tile is pushed once for both reconstructions and
    # the stacked 2*bs rows exactly fill one bf16 sublane tile.
    lhs = jnp.concatenate([topk_t, dead_t], axis=0).astype(jnp.bfloat16)   # (2*bs, s_tile)
    out = lax.dot_general(lhs, w_ref[...], (((1,), (0,)), ((), ())),
                          preferred_element_type=jnp.float32)              # (2*bs, d_tile)
    # TODO(synk): exploit sparsity (<= k*bs + 2k*bs nonzeros) with an index gather of
    # W_dec rows instead of streaming the dense decoder weight every step.
    recon_ref[...] += out[:bs, :]
    dead_ref[...] += out[bs:, :]

    @pl.when(s == pl.num_programs(1) - 1)
    def _fin():
        recon_ref[...] += bias_ref[...]


# --------------------------------------------------------------------------------------
# Generation-aware config + tiling
# --------------------------------------------------------------------------------------
def _hw_config(input_dim):
    """Pick (vmem_limit_bytes, s_tile_cap, n_d_shards) per TPU generation."""
    vmem_phys = 64 * 1024 * 1024
    try:
        info = pltpu.get_tpu_info()
        vmem_phys = int(getattr(info, "vmem_capacity_bytes", vmem_phys))
    except Exception:
        pass
    if vmem_phys >= 128 * 1024 * 1024:
        # v5e / v6e: 128 MiB VMEM, single TensorCore -> bigger tiles, no D split.
        return 64 * 1024 * 1024, 1024, 1
    # v7x-class: 64 MiB VMEM, 2 TensorCores -> conservative tiles; split decode over D
    # halves so the second core is not idle on the "arbitrary" S sweep.
    n_d = 2 if input_dim % 256 == 0 else 1
    return 32 * 1024 * 1024, 512, n_d


def _pick_s_tile(sparse_dim, cap):
    """Largest S tile (multiple of 128, <= cap) that splits S into >= 2 tiles."""
    for t in (1024, 512, 256, 128):
        if t <= cap and sparse_dim % t == 0 and sparse_dim // t >= 2:
            return t
    return sparse_dim


def sae_bias_pre_forward(x, bias_pre, w_enc, w_dec, last_activation, *, k, dead_threshold):
    """Pallas implementation of SAE_bias_pre.forward.

    w_enc: linear.weight        (sparse_dim, input_dim)
    w_dec: linear2.weight.T     (sparse_dim, input_dim)  -- decoder rows, contiguous;
           for this model linear2.weight = linear.weight.T, so w_dec has w_enc's layout.
    Weights are streamed as bf16 (pass them pre-cast to bf16 to avoid a per-call cast).
    Returns (recon, dead_recon, new_last_activation, tau) where tau is the value the
    PyTorch module accumulates into self.mean_of_min_act (topk_values[-1]).
    """
    bs, input_dim = x.shape
    sparse_dim = w_enc.shape[0]
    assert w_enc.shape == (sparse_dim, input_dim)
    assert w_dec.shape == (sparse_dim, input_dim)
    assert 2 * k <= sparse_dim, "need 2*k <= sparse_dim"
    assert bs % 8 == 0 and input_dim % 128 == 0 and sparse_dim % 128 == 0, \
        "lane-dense shapes required (bs % 8 == 0, dims % 128 == 0)"

    vmem_limit, s_cap, n_d = _hw_config(input_dim)
    s_tile = _pick_s_tile(sparse_dim, s_cap)
    n_s = sparse_dim // s_tile
    d_tile = input_dim // n_d

    # bf16 weights in HBM (the dominant streaming traffic) and bf16 centered input,
    # computed once instead of per S tile.
    w_enc = w_enc if w_enc.dtype == jnp.bfloat16 else w_enc.astype(jnp.bfloat16)
    w_dec = w_dec if w_dec.dtype == jnp.bfloat16 else w_dec.astype(jnp.bfloat16)
    xc = (x - bias_pre[None, :]).astype(jnp.bfloat16)
    bias2d = bias_pre.reshape(1, input_dim).astype(jnp.float32)
    la2d = last_activation.reshape(1, sparse_dim).astype(jnp.float32)

    # ---- kernel 1: encoder (S tiled, "parallel" -> sharded over megacore TCs) ----
    h = pl.pallas_call(
        _encoder_kernel,
        out_shape=jax.ShapeDtypeStruct((bs, sparse_dim), jnp.float32),
        grid=(n_s,),
        in_specs=[
            pl.BlockSpec((bs, input_dim), lambda s: (0, 0)),
            pl.BlockSpec((s_tile, input_dim), lambda s: (s, 0)),
        ],
        out_specs=pl.BlockSpec((bs, s_tile), lambda s: (0, s)),
        compiler_params=pltpu.CompilerParams(
            dimension_semantics=("parallel",),
            vmem_limit_bytes=vmem_limit),
    )(xc, w_enc)
    # TODO(synk): for large bs, fuse kernels 1 and 3 into one pallas_call (encode into a
    # VMEM-resident h scratch, then decode) to avoid the (bs, S) f32 HBM round trip.

    # ---- kernel 2: global / per-row dead threshold keys + last_activation update ----
    thr_kernel = functools.partial(_threshold_kernel, k=int(k),
                                   dead_threshold=float(dead_threshold))
    la_new, gkey, rkeys = pl.pallas_call(
        thr_kernel,
        out_shape=(jax.ShapeDtypeStruct((1, sparse_dim), jnp.float32),
                   jax.ShapeDtypeStruct((1, 1), jnp.int32),
                   jax.ShapeDtypeStruct((bs, 1), jnp.int32)),
        grid=(1,),
        in_specs=[
            pl.BlockSpec((bs, sparse_dim), lambda i: (0, 0)),
            pl.BlockSpec((1, sparse_dim), lambda i: (0, 0)),
        ],
        out_specs=(
            pl.BlockSpec((1, sparse_dim), lambda i: (0, 0)),
            pl.BlockSpec((1, 1), lambda i: (0, 0)),
            pl.BlockSpec((bs, 1), lambda i: (0, 0)),
        ),
        compiler_params=pltpu.CompilerParams(
            dimension_semantics=("arbitrary",),
            vmem_limit_bytes=vmem_limit),
    )(h, la2d)

    # ---- kernel 3: key-space selection + fused decode (grid (n_d, n_s)) ----
    dec_kernel = functools.partial(_decode_kernel,
                                   dead_threshold=float(dead_threshold), s_tile=s_tile)
    recon, dead_recon = pl.pallas_call(
        dec_kernel,
        out_shape=(jax.ShapeDtypeStruct((bs, input_dim), jnp.float32),
                   jax.ShapeDtypeStruct((bs, input_dim), jnp.float32)),
        grid=(n_d, n_s),
        in_specs=[
            pl.BlockSpec((bs, sparse_dim), lambda d, s: (0, 0)),   # h (resident)
            pl.BlockSpec((1, sparse_dim), lambda d, s: (0, 0)),    # updated last_activation
            pl.BlockSpec((1, 1), lambda d, s: (0, 0)),             # global threshold key
            pl.BlockSpec((bs, 1), lambda d, s: (0, 0)),            # per-row dead keys
            pl.BlockSpec((1, d_tile), lambda d, s: (0, d)),        # bias_pre (D sharded)
            pl.BlockSpec((s_tile, d_tile), lambda d, s: (s, d)),   # W_dec tile, streamed
        ],
        out_specs=(
            pl.BlockSpec((bs, d_tile), lambda d, s: (0, d)),
            pl.BlockSpec((bs, d_tile), lambda d, s: (0, d)),
        ),
        compiler_params=pltpu.CompilerParams(
            dimension_semantics=("parallel", "arbitrary"),
            vmem_limit_bytes=vmem_limit),
    )(h, la_new, gkey, rkeys, bias2d, w_dec)

    tau = _key_to_float(gkey)[0, 0]    # exact (k*bs)-th largest activation (no ties)
    # TODO(synk): the host-side running scalar self.mean_of_min_act is returned as `tau`
    # instead of being accumulated as Python-side module state.
    return recon, dead_recon, la_new.reshape(-1), tau


def _ref_forward(x, bias_pre, w_enc, w_dec, last_activation, k, dead_threshold):
    """Pure-JAX reference mirroring the PyTorch forward (bf16 MXU math like the kernels)."""
    bs = x.shape[0]
    xc = (x - bias_pre).astype(jnp.bfloat16)
    h = jnp.dot(xc, w_enc.astype(jnp.bfloat16).T, preferred_element_type=jnp.float32)
    flat = h.reshape(-1)
    vals, idx = jax.lax.top_k(flat, k * bs)
    topk_flat = jnp.zeros_like(flat).at[idx].set(vals)
    non_dead = (topk_flat != 0).reshape(bs, -1)
    fired = jnp.any(non_dead, axis=0)
    la = (last_activation + 1.0) * (1.0 - fired.astype(jnp.float32))
    dmask = la > dead_threshold
    dead_act = jnp.where(dmask[None, :], h, -jnp.inf)
    dvals, didx = jax.lax.top_k(dead_act, 2 * k)
    dvals = jnp.where(jnp.isinf(dvals), 0.0, dvals)
    dead_topk = jnp.zeros_like(h).at[jnp.arange(bs)[:, None], didx].set(dvals)
    wd = w_dec.astype(jnp.bfloat16)                                    # (S, D)
    dead_recon = jnp.dot(dead_topk.astype(jnp.bfloat16), wd,
                         preferred_element_type=jnp.float32)
    recon = jnp.dot(topk_flat.reshape(bs, -1).astype(jnp.bfloat16), wd,
                    preferred_element_type=jnp.float32) + bias_pre
    return recon, dead_recon, la, vals[-1]


if __name__ == "__main__":
    # Small deterministic setup (lane-dense: D multiple of 128, bs multiple of 8,
    # S large enough to exercise at least two S tiles in the decode grid).
    bs, input_dim, sparse_dim, k = 8, 128, 1024, 4
    dead_threshold = 0.0

    key = jax.random.PRNGKey(0)
    kx, kw, kb_ = jax.random.split(key, 3)
    x = jax.random.normal(kx, (bs, input_dim), jnp.float32)
    w1 = jax.random.normal(kw, (sparse_dim, input_dim), jnp.float32) / jnp.sqrt(input_dim)
    # linear.weight = w1 (S, D); linear2.weight = w1.T  =>  decoder rows w_dec = w1.
    w_enc = w1.astype(jnp.bfloat16)     # weights stored in bf16 HBM (no per-call cast)
    w_dec = w1.astype(jnp.bfloat16)
    bias_pre = 0.1 * jax.random.normal(kb_, (input_dim,), jnp.float32)
    last_activation = jnp.zeros((sparse_dim,), jnp.float32)

    recon, dead_recon, la_new, tau = sae_bias_pre_forward(
        x, bias_pre, w_enc, w_dec, last_activation, k=k, dead_threshold=dead_threshold)
    jax.block_until_ready((recon, dead_recon, la_new, tau))

    # Verify against a plain-JAX mirror of the PyTorch semantics (no-ties assumption).
    r_exp, dr_exp, la_exp, tau_exp = _ref_forward(
        x, bias_pre, w_enc, w_dec, last_activation, k, dead_threshold)
    assert jnp.allclose(recon, r_exp, atol=1e-2, rtol=1e-2), "recon mismatch"
    assert jnp.allclose(dead_recon, dr_exp, atol=1e-2, rtol=1e-2), "dead_recon mismatch"
    assert jnp.allclose(la_new, la_exp), "last_activation mismatch"
    assert jnp.allclose(tau, tau_exp, atol=1e-3, rtol=1e-3), "tau mismatch"

    print("KERNEL_OK")
</pallas_src>

<mosaic_0001>
module attributes {stable_mosaic.version = 11 : i64} {
  func.func @_encoder_kernel(%arg0: i32, %arg1: memref<8x128xbf16, #tpu.memory_space<vmem>>, %arg2: memref<512x128xbf16, #tpu.memory_space<vmem>>, %arg3: memref<8x512xf32, #tpu.memory_space<vmem>>) attributes {dimension_semantics = [#tpu.dimension_semantics<parallel>], iteration_bounds = array<i64: 2>, scalar_prefetch = 0 : i64, scratch_operands = 0 : i64, tpu.core_type = #tpu.core_type<tc>, window_params = [{pipeline_mode = #tpu.pipeline_mode<synchronous>, transform_indices = @transform_0, window_bounds = array<i64: 8, 128>}, {transform_indices = @transform_1, window_bounds = array<i64: 512, 128>}, {transform_indices = @transform_2, window_bounds = array<i64: 8, 512>}]} {
    %c0 = arith.constant 0 : index
    %c0_0 = arith.constant 0 : index
    %0 = vector.load %arg1[%c0, %c0_0] : memref<8x128xbf16, #tpu.memory_space<vmem>>, vector<8x128xbf16>
    %c0_1 = arith.constant 0 : index
    %c0_2 = arith.constant 0 : index
    %1 = vector.load %arg2[%c0_1, %c0_2] : memref<512x128xbf16, #tpu.memory_space<vmem>>, vector<512x128xbf16>
    %cst = arith.constant dense<0.000000e+00> : vector<8x512xf32>
    %2 = tpu.matmul %0, %1, %cst {dimension_numbers = #tpu.dot_dimension_numbers<[1], [1], [0], [0], [0, 0, 1, 0], [], []>} : vector<8x128xbf16>, vector<512x128xbf16>, vector<8x512xf32> -> vector<8x512xf32>
    %c0_3 = arith.constant 0 : index
    %c0_4 = arith.constant 0 : index
    %3 = vector.load %arg3[%c0_3, %c0_4] : memref<8x512xf32, #tpu.memory_space<vmem>>, vector<8x512xf32>
    tpu.vector_store %arg3[%c0_3, %c0_4], %2 {strides = array<i32>} : memref<8x512xf32, #tpu.memory_space<vmem>>, vector<8x512xf32>,
    return
  }
  func.func @transform_0(%arg0: i32) -> (i32, i32) {
    %c0_i32 = arith.constant 0 : i32
    %c0_i32_0 = arith.constant 0 : i32
    %c0_i32_1 = arith.constant 0 : i32
    return %c0_i32, %c0_i32_0 : i32, i32
  }
  func.func @transform_1(%arg0: i32) -> (i32, i32) {
    %c0_i32 = arith.constant 0 : i32
    %c0_i32_0 = arith.constant 0 : i32
    return %arg0, %c0_i32 : i32, i32
  }
  func.func @transform_2(%arg0: i32) -> (i32, i32) {
    %c0_i32 = arith.constant 0 : i32
    %c0_i32_0 = arith.constant 0 : i32
    return %c0_i32, %arg0 : i32, i32
  }
}

</mosaic_0001>

<bundles_post_ra>
// kernel: tpu_custom_call.1
= control target key start
LH: loop header
LB: loop body
LE: loop exit
PB: predicated region body
PF: predicated region fallthrough
CT: control target
= control target key end

     0   :  { %7 = vsyncpa [#allocation3], 0  ;;  %s1176_s0 = inlined_call_operand.hbm [shape: bf16[8,128], index: 0, kind: input, shape index: {}]   ;;  %s1177_s1 = inlined_call_operand.hbm [shape: bf16[1024,128], index: 1, kind: input, shape index: {}]   ;;  %s1178_s2 = inlined_call_operand.hbm [shape: f32[8,1024], index: 2, kind: output, shape index: {}]  }
   0x1   :  { %8 = vsyncpa [#allocation6], 0 }
   0x2   :  { %10 = vsyncpa [#allocation6 + $0x1], 0 }
   0x3   :  { %11 = vsyncpa [#allocation4], 0 }
   0x4   :  { %13 = vsyncpa [#allocation4 + $0x1], 0  ;;  %s945_s9 = smov 0   ;;  %s947_s10 = smov 0  }
   0x5   :  { %s949_s11 = smov 0   ;;  %s951_s12 = smov 0  }
   0x6 LB: > { %s966_s13 = sadd.s32 4294967295, %s923_s12   ;;  %s618_s14 = sadd.s32 4294967294, %s923_s12   ;;  %s923_s12 = sphi %s951_s12, %s1203_s12   ;;  %s919_s11 = sphi %s949_s11, %s1202_s11   ;;  %s915_s10 = sphi %s947_s10, %s1201_s10   ;;  %s911_s9 = sphi %s945_s9, %s1200_s9  }
   0x7   : > { %s970_s15 = sadd.s32 1, %s923_s12   ;;  %s47_s16 = sadd.s32 1, %s919_s11 }
   0x8   : > { %s44_s17 = ssub.s32 %s923_s12, %s970_s15  ;;  %p54_p0 = scmp.ne.s32.totalorder %s919_s11, %s915_s10 }
   0x9   : > { %p45_p1 = scmp.eq.s32.totalorder %s44_s17, 0  ;;  %p55_p2 = scmp.eq.s32.totalorder %s923_s12, 0 }
   0xa   : > { %p60_p3 = scmp.ne.s32.totalorder %s915_s10, %s911_s9  ;;  %p1179_p4 = scmp.eq.s32.totalorder %s966_s13, 0 }
   0xb   : > { %s982_s18 = scalar_select %p45_p1, %s919_s11, %s47_s16  }
   0xc   : > { %p984_p5 = por %p55_p2, %p54_p0  ;;  %p990_p6 = por %p1179_p4, %p60_p3 }
   0xd   : > { %p84_p7 = scmp.eq.s32.totalorder %s966_s13, 1  ;;  %p90_p8 = scmp.eq.s32.totalorder %s618_s14, 1 }
   0xe   : > { %s1185_s20 = scalar_select %p990_p6, 1, 0 }
   0xf   : > { %p619_p9 = scmp.ge.s32.totalorder %s923_s12, 1  ;;  %p97_p10 = scmp.lt.s32.totalorder %s923_s12, 3 }
  0x10   : > { %p997_p11 = por %p84_p7, %p54_p0  ;;  %p1001_p12 = por %p90_p8, %p60_p3 }
  0x11   : > { %p1005_p13 = pnand %p619_p9, %p97_p10  ;;  %s925_s24 = smov [#allocation2]  }
  0x12   : > { %s1186_s21 = scalar_select %p997_p11, 1, 0 }
  0x13   : > { %s1187_s22 = scalar_select %p1001_p12, 1, 0 }
  0x14   : > { %s1188_s23 = scalar_select %p1005_p13, 1, 0 }
  0x15   : > { %p712_p2 = pneg %p1005_p13  ;;  %s110_s25 = sshll.u32 %s925_s24, 4  ;;  %s111_s25 = int_to_ptr.vmem [resolvable:$true] %s110_s25 }
  0x16   : > { %p725_p4 = scmp.lt.s32.totalorder %s923_s12, 2  ;;  %p1189_p0 = scmp.eq.s32.totalorder %s966_s13, 0 }
  0x17   : > { %s121_s27 = sand.u32 1, %s919_s11   ;;  %s795_s4 = scalar_lea.hbm %s1176_s0, 64 }
  0x18   : > { %p1015_p7 = pnand %p712_p2, %p1189_p0  ;;  %p1022_p3 = pnand %p725_p4, %p984_p5 }
  0x19   : > { %s622_s29 = sshll.u32 %s121_s27, 8  ;;  %p796_p8 = scmp.ne.s32.totalorder %s1176_s0, %s795_s4 }
  0x1a   : > { %s1191_s28 = scalar_select %p1022_p3, 1, 0 }
  0x1b   : > { %p797_p9 = pneg %p1015_p7  ;;  %p802_p4 = scmp.lt.u32.totalorder %s795_s4, %s1176_s0 }
  0x1d   : > { %p798_p10 = pnand %p797_p9, %p796_p8 }
  0x1f   : > { %p799_p2 = pneg %p798_p10 }
  0x21   : > { %p804_p5 = pnand %p802_p4, %p799_p2 }
  0x23   : > { %807 = shalt.err (!%p804_p5)
}
  0x24   : > { %s808_s14 = scalar_lea.vmem %s111_s25, 64  ;;  %p816_p11 = scmp.lt.s32.totalorder %s111_s25, %s111_s25 }
  0x25   : > { %p809_p0 = scmp.ne.s32.totalorder %s111_s25, %s808_s14  ;;  %p817_p6 = scmp.lt.s32.totalorder %s808_s14, %s808_s14 }
  0x27   : > { %p811_p1 = pnand %p809_p0, %p797_p9  ;;  %p818_p13 = por %p817_p6, %p816_p11 }
  0x29   : > { %p812_p12 = pneg %p811_p1 }
  0x2b   : > { %p819_p3 = pnand %p818_p13, %p812_p12 }
  0x2d   : > { %822 = shalt.err (!%p819_p3)
}
  0x2e   : > { %715 = dma.hbm_to_vmem [thread:$0]  (!%p1015_p7), %s1176_s0, 64, %s111_s25, [#allocation3]  }
  0x2f   : > { %s666_s19 = sshll.u32 %s923_s12, 12  ;;  %s125_s24 = scalar_lea.vmem [#allocation5], %s622_s29 }
  0x30   : > { %s132_s30 = sshll.u32 %s125_s24, 4  ;;  %s1046_s5 = scalar_lea.hbm %s1177_s1, %s666_s19  ;;  %s1048_s30 = int_to_ptr.vmem [resolvable:$true] %s132_s30 }
  0x31   : > { %s1050_s26 = scalar_lea.sflag [#allocation6], %s121_s27  ;;  %s823_s6 = scalar_lea.hbm %s1046_s5, 4096 }
  0x32   : > { %p824_p6 = scmp.ne.s32.totalorder %s1046_s5, %s823_s6  ;;  %p1192_p11 = scmp.ne.s32.totalorder %s1191_s28, 0 }
  0x33   : > { %s828_s7 = scalar_lea.hbm %s1177_s1, 8192  ;;  %p829_p7 = scmp.lt.u32.totalorder %s1046_s5, %s1177_s1 }
  0x34   : > { %p825_p12 = pneg %p1192_p11  ;;  %p830_p3 = scmp.lt.u32.totalorder %s828_s7, %s823_s6 }
  0x35   : > { %p832_p9 = scmp.lt.u32.totalorder %s823_s6, %s1046_s5 }
  0x36   : > { %p826_p13 = pnand %p825_p12, %p824_p6  ;;  %p831_p8 = por %p830_p3, %p829_p7 }
  0x38   : > { %p827_p1 = pneg %p826_p13  ;;  %p833_p10 = por %p832_p9, %p831_p8 }
  0x3a   : > { %p834_p2 = pnand %p833_p10, %p827_p1 }
  0x3c   : > { %837 = shalt.err (!%p834_p2)
}
  0x3d   : > { %s838_s27 = scalar_lea.vmem %s1048_s30, 4096  ;;  %s926_s16 = smov [#allocation5]  }
  0x3e   : > { %p839_p4 = scmp.ne.s32.totalorder %s1048_s30, %s838_s27  ;;  %s843_s17 = sshll.u32 %s926_s16, 4  ;;  %s844_s17 = int_to_ptr.vmem [resolvable:$false] %s843_s17 }
  0x3f   : > { %s845_s19 = scalar_lea.vmem %s844_s17, 8192  ;;  %p846_p6 = scmp.lt.s32.totalorder %s1048_s30, %s844_s17 }
  0x40   : > { %p841_p5 = pnand %p839_p4, %p825_p12  ;;  %p847_p13 = scmp.lt.s32.totalorder %s845_s19, %s838_s27 }
  0x42   : > { %p842_p0 = pneg %p841_p5  ;;  %p848_p7 = por %p847_p13, %p846_p6 }
  0x44   : > { %p849_p3 = pnand %p848_p7, %p842_p0 }
  0x46   : > { %852 = shalt.err (!%p849_p3)
}
  0x47   : > { %s927_s24 = smov 64   ;;  %s928_s3 = smov 4  }
  0x48   : > { %719 = dma.hbm_to_vmem [thread:$0]  (!%p1192_p11), %s1046_s5, 4096, %s1048_s30, %s1050_s26, %s927_s24, %s927_s24, %s928_s3  }
  0x49   : > { %p1193_p12 = scmp.ne.s32.totalorder %s1188_s23, 0 }
  0x4a   : > { %p1194_p1 = scmp.eq.s32.totalorder (!%p1193_p12), %s966_s13, 0 }
  0x4b   : > { %144 = sbr.rel (%p1193_p12) target bundleno = 382 (0x17e), region = 28 }
  0x52   : > { %898 = dma.done.wait (%p1194_p1), [#allocation3], 64   ;;  %p1195_p8 = pmov %p1194_p1 }
  0x53   : > { %s1085_s4 = sand.u32 1, %s915_s10   ;;  %p1196_p11 = scmp.ne.s32.totalorder %s1185_s20, 0 }
  0x54   : > { %900 = vsyncadd (%p1195_p8), [#allocation3], 4294967232  ;;  %s627_s6 = sshll.u32 %s1085_s4, 8  ;;  %s151_s25 = scalar_lea.sflag [#allocation6], %s1085_s4 }
  0x55   : > { %s1089_s29 = scalar_lea.vmem [#allocation5], %s627_s6 }
  0x56   : > { %902 = dma.done.wait (%p1196_p11), %s151_s25, 4096  }
  0x57   : > { %904 = vsyncadd (%p1196_p11), %s151_s25, 4294963200  ;;  %v763_v0 = vld [vmem:[%s1089_s29 + $0x40] sm:$0xff]   ;;  %v767_v4 = vld [vmem:[%s1089_s29 + $0x48] sm:$0xff]   ;;  %s628_s20 = sshll.u32 %s1085_s4, 5  ;;  %s667_s30 = sshll.u32 %s966_s13, 9 }
  0x58   : > { %v764_v1 = vld [vmem:[%s1089_s29 + $0xc0] sm:$0xff]   ;;  %668 = vmatprep.subr.bf16.mxu0 %v763_v0  ;;  %v768_v5 = vld [vmem:[%s1089_s29 + $0xc8] sm:$0xff]   ;;  %v771_v8 = vld [vmem:[%s1089_s29 + $0x50] sm:$0xff]   ;;  %s174_s23 = scalar_lea.vmem [#allocation7], %s628_s20  ;;  %s1134_s7 = scalar_lea.hbm %s1178_s2, %s667_s30 }
  0x59   : > { %v765_v2 = vld [vmem:[%s1089_s29] sm:$0xff]   ;;  %686 = vmatprep.subr.bf16.mxu1 %v764_v1  ;;  %v769_v6 = vld [vmem:[%s1089_s29 + $0x8] sm:$0xff]   ;;  %v772_v9 = vld [vmem:[%s1089_s29 + $0xd0] sm:$0xff]   ;;  %s536_s28 = sshll.u32 %s174_s23, 4  ;;  %s522_s13 = scalar_lea.sflag [#allocation4], %s1085_s4  ;;  %s1129_s28 = int_to_ptr.vmem [resolvable:$true] %s536_s28 }
  0x5a   : > { %v766_v3 = vld [vmem:[%s1089_s29 + $0x80] sm:$0xff]   ;;  %669 = vmatpush3.bf16.xpose.msra.mxu0 %v765_v2  ;;  %v770_v7 = vld [vmem:[%s1089_s29 + $0x88] sm:$0xff]   ;;  %v773_v10 = vld [vmem:[%s1089_s29 + $0x10] sm:$0xff]   ;;  %s853_s8 = scalar_lea.vmem %s1129_s28, 512  ;;  %p1197_p10 = scmp.ne.s32.totalorder %s1186_s21, 0 }
  0x5b   : > { %687 = vmatpush3.bf16.xpose.msra.mxu1 %v766_v3  ;;  %670 = vmatprep.subr.bf16.mxu0 %v767_v4  ;;  %v774_v11 = vld [vmem:[%s1089_s29 + $0x90] sm:$0xff]   ;;  %v775_v12 = vld [vmem:[%s1089_s29 + $0x58] sm:$0xff]   ;;  %v779_v16 = vld [vmem:[%s1089_s29 + $0x60] sm:$0xff]   ;;  %p854_p9 = scmp.ne.s32.totalorder %s1129_s28, %s853_s8  ;;  %s929_s14 = smov [#allocation7]  }
  0x5c   : > { %688 = vmatprep.subr.bf16.mxu1 %v768_v5  ;;  %v776_v13 = vld [vmem:[%s1089_s29 + $0xd8] sm:$0xff]   ;;  %v780_v17 = vld [vmem:[%s1089_s29 + $0xe0] sm:$0xff]   ;;  %v783_v21 = vld [vmem:[%s1089_s29 + $0x68] sm:$0xff]   ;;  %s857_s27 = sshll.u32 %s929_s14, 4  ;;  %s858_s27 = int_to_ptr.vmem [resolvable:$false] %s857_s27 }
  0x5d   : > { %v777_v14 = vld [vmem:[%s1089_s29 + $0x18] sm:$0xff]   ;;  %v781_v18 = vld [vmem:[%s1089_s29 + $0x20] sm:$0xff]   ;;  %v784_v22 = vld [vmem:[%s1089_s29 + $0xe8] sm:$0xff]   ;;  %p855_p2 = pnand %p854_p9, %p1197_p10  ;;  %s859_s16 = scalar_lea.vmem %s858_s27, 1024 }
  0x5e   : > { %v778_v15 = vld [vmem:[%s1089_s29 + $0x98] sm:$0xff]   ;;  %v782_v20 = vld [vmem:[%s1089_s29 + $0xa0] sm:$0xff]   ;;  %v785_v23 = vld [vmem:[%s1089_s29 + $0x28] sm:$0xff]   ;;  %p860_p5 = scmp.lt.s32.totalorder %s1129_s28, %s858_s27  ;;  %p861_p0 = scmp.lt.s32.totalorder %s859_s16, %s853_s8 }
  0x5f   : > { %v178_v19 = vld [vmem:[#allocation2] sm:$0xf]  ;;  %v786_v24 = vld [vmem:[%s1089_s29 + $0xa8] sm:$0xff]   ;;  %v787_v25 = vld [vmem:[%s1089_s29 + $0x70] sm:$0xff]   ;;  %p856_p4 = pneg %p855_p2 }
  0x60   : > { %684 = vmatprep.mubr.bf16.mxu0 %v178_v19  ;;  %702 = vmatprep.mubr.bf16.mxu1 %v178_v19  ;;  %v788_v26 = vld [vmem:[%s1089_s29 + $0xf0] sm:$0xff]   ;;  %v791_v29 = vld [vmem:[%s1089_s29 + $0x78] sm:$0xff]   ;;  %p862_p6 = por %p861_p0, %p860_p5 }
  0x61   : > { %v789_v27 = vld [vmem:[%s1089_s29 + $0x30] sm:$0xff]   ;;  %v792_v30 = vld [vmem:[%s1089_s29 + $0xf8] sm:$0xff]  }
  0x62   : > { %671 = vmatpush3.bf16.xpose.msra.mxu0 %v769_v6  ;;  %v790_v28 = vld [vmem:[%s1089_s29 + $0xb0] sm:$0xff]   ;;  %v793_v31 = vld [vmem:[%s1089_s29 + $0x38] sm:$0xff]   ;;  %p863_p13 = pnand %p862_p6, %p856_p4 }
  0x63   : > { %689 = vmatpush3.bf16.xpose.msra.mxu1 %v770_v7  ;;  %672 = vmatprep.subr.bf16.mxu0 %v771_v8  ;;  %v794_v32 = vld [vmem:[%s1089_s29 + $0xb8] sm:$0xff]  }
  0x64   : > { %690 = vmatprep.subr.bf16.mxu1 %v772_v9 }
  0x6a   : > { %673 = vmatpush3.bf16.xpose.msra.mxu0 %v773_v10 }
  0x6b   : > { %691 = vmatpush3.bf16.xpose.msra.mxu1 %v774_v11  ;;  %674 = vmatprep.subr.bf16.mxu0 %v775_v12 }
  0x6c   : > { %692 = vmatprep.subr.bf16.mxu1 %v776_v13 }
  0x72   : > { %675 = vmatpush3.bf16.xpose.msra.mxu0 %v777_v14 }
  0x73   : > { %693 = vmatpush3.bf16.xpose.msra.mxu1 %v778_v15  ;;  %676 = vmatprep.subr.bf16.mxu0 %v779_v16 }
  0x74   : > { %694 = vmatprep.subr.bf16.mxu1 %v780_v17 }
  0x7a   : > { %677 = vmatpush3.bf16.xpose.msra.mxu0 %v781_v18 }
  0x7b   : > { %695 = vmatpush3.bf16.xpose.msra.mxu1 %v782_v20  ;;  %678 = vmatprep.subr.bf16.mxu0 %v783_v21 }
  0x7c   : > { %696 = vmatprep.subr.bf16.mxu1 %v784_v22 }
  0x82   : > { %679 = vmatpush3.bf16.xpose.msra.mxu0 %v785_v23 }
  0x83   : > { %697 = vmatpush3.bf16.xpose.msra.mxu1 %v786_v24  ;;  %680 = vmatprep.subr.bf16.mxu0 %v787_v25 }
  0x84   : > { %698 = vmatprep.subr.bf16.mxu1 %v788_v26 }
  0x8a   : > { %681 = vmatpush3.bf16.xpose.msra.mxu0 %v789_v27 }
  0x8b   : > { %699 = vmatpush3.bf16.xpose.msra.mxu1 %v790_v28  ;;  %682 = vmatprep.subr.bf16.mxu0 %v791_v29 }
  0x8c   : > { %700 = vmatprep.subr.bf16.mxu1 %v792_v30 }
  0x92   : > { %683 = vmatpush3.bf16.xpose.msra.mxu0 %v793_v31 }
  0x93   : > { %701 = vmatpush3.bf16.xpose.msra.mxu1 %v794_v32 }
  0x99   : > { %685 = vmatmul.mubr.bf16.vlgmr.msra.gmra.mrb[0].mxu0 %v178_v19 }
  0x9a   : > { %703 = vmatmul.mubr.bf16.vlgmr.msra.gmra.mrb[0].mxu1 %v178_v19 }
 0x16c   : > { %v469_v33 = vpop.f32.mrb[0].mxu0 }
 0x16d   : > { %517 = vst [vmem:[%s174_s23] sm:$0xff] %v469_v33  ;;  %v510_v34 = vpop.f32.mrb[0].mxu1  ;;  %v471_v35 = vpop.f32.mrb[1].mxu0 }
 0x16e   : > { %519 = vst [vmem:[%s174_s23 + $0x10] sm:$0xff] %v510_v34  ;;  %518 = vst [vmem:[%s174_s23 + $0x8] sm:$0xff] %v471_v35  ;;  %v512_v36 = vpop.f32.mrb[1].mxu1  ;;  %v473_v37 = vpop.f32.mrb[2].mxu0 }
 0x16f   : > { %520 = vst [vmem:[%s174_s23 + $0x18] sm:$0xff] %v512_v36  ;;  %v514_v38 = vpop.f32.mrb[2].mxu1  ;;  %v474_v39 = vpop.f32.mrb[3].mxu0 }
 0x170   : > { %v515_v40 = vpop.f32.mrb[3].mxu1 }
 0x171   : > { %866 = shalt.err (!%p863_p13)
}
 0x172   : > { %s867_s17 = scalar_lea.hbm %s1134_s7, 512  ;;  %s871_s3 = scalar_lea.hbm %s1178_s2, 1024 }
 0x173   : > { %p868_p7 = scmp.ne.s32.totalorder %s1134_s7, %s867_s17  ;;  %p872_p1 = scmp.lt.u32.totalorder %s1134_s7, %s1178_s2 }
 0x174   : > { %p873_p8 = scmp.lt.u32.totalorder %s871_s3, %s867_s17  ;;  %p875_p9 = scmp.lt.u32.totalorder %s867_s17, %s1134_s7 }
 0x175   : > { %p869_p3 = pnand %p868_p7, %p1197_p10 }
 0x176   : > { %p874_p11 = por %p873_p8, %p872_p1 }
 0x177   : > { %p870_p12 = pneg %p869_p3 }
 0x178   : > { %p876_p2 = por %p875_p9, %p874_p11 }
 0x17a   : > { %p877_p4 = pnand %p876_p2, %p870_p12 }
 0x17c   : > { %880 = shalt.err (!%p877_p4)
}
 0x17d   : > { %710 = dma.vmem_to_hbm [thread:$0]  (%p1197_p10), %s1129_s28, 512, %s1134_s7, %s522_s13  }
 0x17e PF: > { %s548_s25 = sand.u32 1, %s911_s9   ;;  %p1198_p5 = scmp.ne.s32.totalorder %s1187_s22, 0 }
 0x17f   : > { %p1199_p0 = scmp.ge.s32.totalorder %s923_s12, 2  ;;  %s549_s29 = scalar_lea.sflag [#allocation4], %s548_s25 }
 0x181   : > { %p721_p6 = pnand %p1199_p0, %p1198_p5 }
 0x183   : > { %906 = dma.done.wait (!%p721_p6), %s549_s29, 512  }
 0x184   : > { %908 = vsyncadd (!%p721_p6), %s549_s29, 4294966784  ;;  %p16_p13 = scmp.ge.s32.totalorder %s970_s15, 4   ;;  %s1200_s9 = smov %s915_s10 }
 0x185   : > { %s1201_s10 = smov %s919_s11  ;;  %s1202_s11 = smov %s982_s18 }
 0x186   : > { %s1203_s12 = smov %s970_s15  ;;  %18 = sbr.rel (!%p16_p13) target bundleno = 6 (0x6), region = 78 }
 0x18d   :  { %554 = vsyncpa [#allocation3], 1 }
 0x18e   :  { %556 = vsyncpa [#allocation3 + $0x1], 1 }
 0x18f   :  { %557 = vsyncpa [#allocation6], 1 }
 0x190   :  { %559 = vsyncpa [#allocation6 + $0x1], 1 }
 0x191   :  { %560 = vsyncpa [#allocation4], 1 }
 0x192   :  { %562 = vsyncpa [#allocation4 + $0x1], 1 }

</bundles_post_ra>
